<compile_context>
chip_gen: v6e
topology: v6e:2x2x1
jax: 0.10.0
libtpu: 0.0.40
codegen_flags: <defaults>
</compile_context>

<pallas_src>
import math
import functools

import jax
import jax.numpy as jnp
from jax.experimental import pallas as pl
from jax.experimental.pallas import tpu as pltpu


# ----------------------------- helpers --------------------------------------

def _round_up(x, m):
    return (x + m - 1) // m * m


def _pick_tile(total, max_tile, align):
    """Largest multiple of `align` <= max_tile that exactly divides `total`
    (total is assumed to be a multiple of `align`)."""
    t = max(min(max_tile, total), align)
    t = (t // align) * align
    while total % t != 0:
        t -= align
    return t


def _choose_m_tiling(m, tm_max):
    """Pad M to a multiple of 8; prefer shrinking tm over padding M up."""
    mp = _round_up(m, 8)
    tm = _pick_tile(mp, tm_max, 8)
    if tm < min(tm_max, 64) and mp > tm_max:
        # Degenerate exact divisor (e.g. Mp = 8*prime): pad up instead.
        tm = tm_max
        mp = _round_up(mp, tm)
    return mp, tm


def _vmem_limit_bytes():
    try:
        cap = int(pltpu.get_tpu_info().vmem_capacity_bytes)
    except Exception:
        cap = 64 * 1024 * 1024          # conservative (v7x-sized) fallback
    return min((cap * 3) // 4, 96 * 1024 * 1024)


# ----------------------------- kernels --------------------------------------

def _linear_act_kernel_single(x_ref, w_ref, b_ref, o_ref, *, scale, neg_slope):
    # Single K block: no accumulator scratch, dot + fused epilogue.
    # x_ref: (tm, Kp)  w_ref: (Kp, tn)  b_ref: (1, tn) f32  o_ref: (tm, tn)
    y = jnp.dot(x_ref[...], w_ref[...],
                preferred_element_type=jnp.float32) * scale + b_ref[...]
    o_ref[...] = jnp.where(y >= 0.0, y, y * neg_slope).astype(o_ref.dtype)


def _linear_act_kernel_acc(x_ref, w_ref, b_ref, o_ref, acc_ref, *,
                           scale, neg_slope):
    # K-tiled path with f32 VMEM accumulator resident across the K axis.
    k = pl.program_id(2)

    @pl.when(k == 0)
    def _():
        acc_ref[...] = jnp.zeros_like(acc_ref)

    acc_ref[...] += jnp.dot(x_ref[...], w_ref[...],
                            preferred_element_type=jnp.float32)

    @pl.when(k == pl.num_programs(2) - 1)
    def _():
        # scale already includes the equalized-LR factor AND the lrelu gain;
        # bias was pre-multiplied by the gain in prepare_linear_params.
        y = acc_ref[...] * scale + b_ref[...]
        o_ref[...] = jnp.where(y >= 0.0, y, y * neg_slope).astype(o_ref.dtype)


# ----------------------------- wrappers -------------------------------------

def prepare_linear_params(weight, bias=None, *, gain=1.0, act_name="lrelu",
                          compute_dtype=jnp.bfloat16):
    """One-time per-parameter prep: transpose to (K,N), cast to MXU dtype,
    pad K/N to 128, pre-fold the activation gain into scale and bias."""
    out_features, in_features = weight.shape
    scale = gain * in_features ** (-0.5)

    if act_name == "lrelu":
        neg_slope, act_gain = 0.2, math.sqrt(2.0)
    elif act_name == "linear":
        neg_slope, act_gain = 1.0, 1.0
    else:
        # TODO(synk): other bias_act activations (relu/tanh/sigmoid/...) not wired up
        raise NotImplementedError(act_name)

    kp = _round_up(in_features, 128)
    np_ = _round_up(out_features, 128)

    w_t = jnp.transpose(weight).astype(compute_dtype)        # (K, N)
    if (kp, np_) != (in_features, out_features):
        w_t = jnp.pad(w_t, ((0, kp - in_features), (0, np_ - out_features)))

    if bias is None:
        b = jnp.zeros((1, np_), dtype=jnp.float32)
    else:
        b = (bias.astype(jnp.float32) * act_gain).reshape(1, out_features)
        if np_ != out_features:
            b = jnp.pad(b, ((0, 0), (0, np_ - out_features)))

    return dict(
        w_t=w_t, b=b,
        scale=float(scale * act_gain), neg_slope=float(neg_slope),
        in_features=in_features, out_features=out_features,
    )


def equalized_linear_prepared(x, params, *, tm=256, tn=512, tk=2048):
    """x: [..., in_features]; params from prepare_linear_params."""
    w_t, b = params["w_t"], params["b"]
    scale, neg_slope = params["scale"], params["neg_slope"]
    K, N = params["in_features"], params["out_features"]
    Kp, Np = w_t.shape

    orig_shape = x.shape
    out_dtype = x.dtype
    x2d = x.reshape(-1, K)
    M = x2d.shape[0]

    Mp, tm = _choose_m_tiling(M, tm)
    tn = _pick_tile(Np, tn, 128)
    tk = _pick_tile(Kp, tk, 128)

    # v7x has 2 TensorCores: make sure at least one parallel axis has >= 2
    # blocks when possible (harmless on single-TC v5e/v6e).
    if (Mp // tm) * (Np // tn) == 1:
        if Np >= 256:
            tn = _pick_tile(Np, Np // 2, 128)
        elif Mp >= 16:
            tm = _pick_tile(Mp, max(Mp // 2, 8), 8)

    # Cast activations to the MXU dtype; pad only if actually needed.
    xc = x2d.astype(w_t.dtype)
    if (Mp, Kp) != (M, K):
        xc = jnp.pad(xc, ((0, Mp - M), (0, Kp - K)))

    gm, gn, gk = Mp // tm, Np // tn, Kp // tk
    vmem_limit = _vmem_limit_bytes()

    if gk == 1:
        # Weight-stationary / single-K fast path: no K axis, no accumulator.
        kernel = functools.partial(_linear_act_kernel_single,
                                   scale=scale, neg_slope=neg_slope)
        out = pl.pallas_call(
            kernel,
            out_shape=jax.ShapeDtypeStruct((Mp, Np), out_dtype),
            grid_spec=pltpu.PrefetchScalarGridSpec(
                num_scalar_prefetch=0,
                grid=(gm, gn),
                in_specs=[
                    pl.BlockSpec((tm, Kp), lambda i, j: (i, 0)),   # x tile
                    pl.BlockSpec((Kp, tn), lambda i, j: (0, j)),   # w^T tile
                    pl.BlockSpec((1, tn), lambda i, j: (0, j)),    # bias (f32)
                ],
                out_specs=pl.BlockSpec((tm, tn), lambda i, j: (i, j)),
            ),
            compiler_params=pltpu.CompilerParams(
                dimension_semantics=("parallel", "parallel"),
                vmem_limit_bytes=vmem_limit,
            ),
        )(xc, w_t, b)
    else:
        kernel = functools.partial(_linear_act_kernel_acc,
                                   scale=scale, neg_slope=neg_slope)
        out = pl.pallas_call(
            kernel,
            out_shape=jax.ShapeDtypeStruct((Mp, Np), out_dtype),
            grid_spec=pltpu.PrefetchScalarGridSpec(
                num_scalar_prefetch=0,
                grid=(gm, gn, gk),
                in_specs=[
                    pl.BlockSpec((tm, tk), lambda i, j, k: (i, k)),   # x tile
                    pl.BlockSpec((tk, tn), lambda i, j, k: (k, j)),   # w^T tile
                    pl.BlockSpec((1, tn), lambda i, j, k: (0, j)),    # bias (f32)
                ],
                out_specs=pl.BlockSpec((tm, tn), lambda i, j, k: (i, j)),
                scratch_shapes=[pltpu.VMEM((tm, tn), jnp.float32)],
            ),
            compiler_params=pltpu.CompilerParams(
                dimension_semantics=("parallel", "parallel", "arbitrary"),
                vmem_limit_bytes=vmem_limit,
            ),
        )(xc, w_t, b)

    if (Mp, Np) != (M, N):
        out = out[:M, :N]
    return out.reshape(*orig_shape[:-1], N)


def equalized_linear(x, weight, bias=None, *, gain=1.0, act_name="lrelu",
                     tm=256, tn=512, tk=2048):
    """Convenience wrapper (prepares params per call; prefer caching
    prepare_linear_params per parameter in real use)."""
    compute_dtype = jnp.bfloat16 if x.dtype == jnp.float32 else x.dtype
    params = prepare_linear_params(weight, bias, gain=gain, act_name=act_name,
                                   compute_dtype=compute_dtype)
    return equalized_linear_prepared(x, params, tm=tm, tn=tn, tk=tk)


# ----------------------------- demo / check ---------------------------------

def _reference(x, weight, bias, gain=1.0):
    scale = gain * weight.shape[1] ** (-0.5)
    y = x @ (weight * scale).T + bias
    return jnp.where(y >= 0.0, y, y * 0.2) * math.sqrt(2.0)


if __name__ == "__main__":
    key = jax.random.PRNGKey(0)
    k_x, k_w, k_x2, k_w2, k_b2 = jax.random.split(key, 5)

    # --- case 1: small CIPS-like layer, single-K weight-stationary path ----
    batch, seq, in_features, out_features = 2, 8, 32, 64
    weight = jax.random.normal(k_w, (out_features, in_features), dtype=jnp.float32)
    bias = jnp.zeros((out_features,), dtype=jnp.float32)
    x = jax.random.normal(k_x, (batch, seq, in_features), dtype=jnp.float32)

    params = prepare_linear_params(weight, bias, gain=1.0, act_name="lrelu")
    out = equalized_linear_prepared(x, params)
    out = jax.block_until_ready(out)

    ref = _reference(x, weight, bias)
    assert out.shape == (batch, seq, out_features)
    assert jnp.allclose(out, ref, atol=5e-2, rtol=5e-2), (
        f"max abs err {jnp.max(jnp.abs(out - ref))}")

    # --- case 2: force the K-tiled accumulator path (tk=128, K=256) --------
    in2, out2 = 256, 64
    w2 = jax.random.normal(k_w2, (out2, in2), dtype=jnp.float32)
    b2 = 0.1 * jax.random.normal(k_b2, (out2,), dtype=jnp.float32)
    x2 = jax.random.normal(k_x2, (batch, seq, in2), dtype=jnp.float32)

    out_k = equalized_linear(x2, w2, b2, gain=1.0, act_name="lrelu", tk=128)
    out_k = jax.block_until_ready(out_k)
    ref_k = _reference(x2, w2, b2)
    assert out_k.shape == (batch, seq, out2)
    assert jnp.allclose(out_k, ref_k, atol=5e-2, rtol=5e-2), (
        f"max abs err {jnp.max(jnp.abs(out_k - ref_k))}")

    print("KERNEL_OK")
</pallas_src>

<mosaic_0001>
module attributes {stable_mosaic.version = 11 : i64} {
  func.func @_linear_act_kernel_single(%arg0: i32, %arg1: i32, %arg2: memref<8x128xbf16, #tpu.memory_space<vmem>>, %arg3: memref<128x128xbf16, #tpu.memory_space<vmem>>, %arg4: memref<1x128xf32, #tpu.memory_space<vmem>>, %arg5: memref<8x128xf32, #tpu.memory_space<vmem>>) attributes {dimension_semantics = [#tpu.dimension_semantics<parallel>, #tpu.dimension_semantics<parallel>], iteration_bounds = array<i64: 2, 1>, scalar_prefetch = 0 : i64, scratch_operands = 0 : i64, tpu.core_type = #tpu.core_type<tc>, window_params = [{transform_indices = @transform_0, window_bounds = array<i64: 8, 128>}, {transform_indices = @transform_1, window_bounds = array<i64: 128, 128>}, {transform_indices = @transform_2, window_bounds = array<i64: 1, 128>}, {transform_indices = @transform_3, window_bounds = array<i64: 8, 128>}]} {
    %c0 = arith.constant 0 : index
    %c0_0 = arith.constant 0 : index
    %0 = vector.load %arg2[%c0, %c0_0] : memref<8x128xbf16, #tpu.memory_space<vmem>>, vector<8x128xbf16>
    %c0_1 = arith.constant 0 : index
    %c0_2 = arith.constant 0 : index
    %1 = vector.load %arg3[%c0_1, %c0_2] : memref<128x128xbf16, #tpu.memory_space<vmem>>, vector<128x128xbf16>
    %cst = arith.constant dense<0.000000e+00> : vector<8x128xf32>
    %2 = tpu.matmul %0, %1, %cst {dimension_numbers = #tpu.dot_dimension_numbers<[1], [0], [0], [1], [0, 0, 1, 1], [], []>} : vector<8x128xbf16>, vector<128x128xbf16>, vector<8x128xf32> -> vector<8x128xf32>
    %cst_3 = arith.constant 2.500000e-01 : f32
    %3 = vector.broadcast %cst_3 : f32 to vector<8x128xf32>
    %4 = arith.mulf %2, %3 : vector<8x128xf32>
    %c0_4 = arith.constant 0 : index
    %c0_5 = arith.constant 0 : index
    %5 = vector.load %arg4[%c0_4, %c0_5] : memref<1x128xf32, #tpu.memory_space<vmem>>, vector<1x128xf32>
    %6 = vector.broadcast %5 : vector<1x128xf32> to vector<8x128xf32>
    %7 = arith.addf %4, %6 : vector<8x128xf32>
    %cst_6 = arith.constant 0.000000e+00 : f32
    %8 = vector.broadcast %cst_6 : f32 to vector<8x128xf32>
    %9 = arith.cmpf oge, %7, %8 : vector<8x128xf32>
    %cst_7 = arith.constant 2.000000e-01 : f32
    %10 = vector.broadcast %cst_7 : f32 to vector<8x128xf32>
    %11 = arith.mulf %7, %10 : vector<8x128xf32>
    %12 = arith.select %9, %7, %11 : vector<8x128xi1>, vector<8x128xf32>
    %c0_8 = arith.constant 0 : index
    %c0_9 = arith.constant 0 : index
    %13 = vector.load %arg5[%c0_8, %c0_9] : memref<8x128xf32, #tpu.memory_space<vmem>>, vector<8x128xf32>
    tpu.vector_store %arg5[%c0_8, %c0_9], %12 {strides = array<i32>} : memref<8x128xf32, #tpu.memory_space<vmem>>, vector<8x128xf32>,
    return
  }
  func.func @transform_0(%arg0: i32, %arg1: i32) -> (i32, i32) {
    %c0_i32 = arith.constant 0 : i32
    %c0_i32_0 = arith.constant 0 : i32
    return %arg0, %c0_i32 : i32, i32
  }
  func.func @transform_1(%arg0: i32, %arg1: i32) -> (i32, i32) {
    %c0_i32 = arith.constant 0 : i32
    %c0_i32_0 = arith.constant 0 : i32
    return %c0_i32, %arg1 : i32, i32
  }
  func.func @transform_2(%arg0: i32, %arg1: i32) -> (i32, i32) {
    %c0_i32 = arith.constant 0 : i32
    %c0_i32_0 = arith.constant 0 : i32
    return %c0_i32, %arg1 : i32, i32
  }
  func.func @transform_3(%arg0: i32, %arg1: i32) -> (i32, i32) {
    %c0_i32 = arith.constant 0 : i32
    return %arg0, %arg1 : i32, i32
  }
}

</mosaic_0001>

<bundles_post_ra>
// kernel: tpu_custom_call.1
= control target key start
LH: loop header
LB: loop body
LE: loop exit
PB: predicated region body
PF: predicated region fallthrough
CT: control target
= control target key end

     0   :  { %8 = vsyncpa [#allocation3], 0  ;;  %s959_s0 = inlined_call_operand.hbm [shape: bf16[16,128], index: 0, kind: input, shape index: {}]   ;;  %s960_s1 = inlined_call_operand.hbm [shape: bf16[128,128], index: 1, kind: input, shape index: {}]   ;;  %s961_s2 = inlined_call_operand.vmem [shape: f32[1,128], index: 2, kind: input, shape index: {}]   ;;  %s962_s3 = inlined_call_operand.hbm [shape: f32[16,128], index: 3, kind: output, shape index: {}]  }
   0x1   :  { %10 = vsyncpa [#allocation3 + $0x1], 0 }
   0x2   :  { %11 = vsyncpa [#allocation6], 0 }
   0x3   :  { %12 = vsyncpa [#allocation4], 0 }
   0x4   :  { %14 = vsyncpa [#allocation4 + $0x1], 0  ;;  %s779_s12 = smov 0   ;;  %s781_s13 = smov 0  }
   0x5   :  { %s783_s14 = smov 0   ;;  %s785_s15 = smov 0  }
   0x6   :  { %s787_s16 = smov 0   ;;  %s789_s17 = smov 0  }
   0x7 LB: > { %s473_s18 = sadd.s32 4294967295, %s750_s17   ;;  %s474_s19 = sadd.s32 4294967294, %s750_s17   ;;  %s750_s17 = sphi %s789_s17, %s20_s17   ;;  %s746_s16 = sphi %s787_s16, %s980_s16   ;;  %s742_s15 = sphi %s785_s15, %s979_s15   ;;  %s738_s14 = sphi %s783_s14, %s978_s14   ;;  %s734_s13 = sphi %s781_s13, %s977_s13   ;;  %s730_s12 = sphi %s779_s12, %s976_s12  }
   0x8   : > { %p52_p0 = scmp.ne.s32.totalorder %s734_s13, %s730_s12  ;;  %p813_p1 = scmp.eq.s32.totalorder %s473_s18, 0 }
   0x9   : > { %p817_p2 = scmp.eq.s32.totalorder %s473_s18, 1  ;;  %p136_p3 = scmp.eq.s32.totalorder %s474_s19, 1 }
   0xa   : > { %p823_p4 = por %p813_p1, %p52_p0  ;;  %p475_p5 = scmp.ge.s32.totalorder %s750_s17, 1 }
   0xb   : > { %p828_p6 = por %p136_p3, %p52_p0  ;;  %p143_p7 = scmp.lt.s32.totalorder %s750_s17, 3 }
   0xc   : > { %s966_s22 = scalar_select %p823_p4, 1, 0 }
   0xd   : > { %s967_s23 = scalar_select %p828_p6, 1, 0 }
   0xe   : > { %p833_p8 = pnand %p475_p5, %p143_p7  ;;  %s752_s25 = smov [#allocation5]  }
   0xf   : > { %s157_s26 = sshll.u32 %s752_s25, 4  ;;  %s32_s28 = sadd.s32 1, %s746_s16  ;;  %s158_s26 = int_to_ptr.vmem [resolvable:$true] %s157_s26 }
  0x10   : > { %p535_p9 = pneg %p833_p8  ;;  %s623_s29 = scalar_lea.vmem %s158_s26, 1024 }
  0x11   : > { %p624_p13 = scmp.ne.s32.totalorder %s158_s26, %s623_s29  ;;  %p631_p5 = scmp.lt.s32.totalorder %s158_s26, %s158_s26 }
  0x12   : > { %p842_p11 = pnand %p535_p9, %p813_p1  ;;  %p632_p7 = scmp.lt.s32.totalorder %s623_s29, %s623_s29 }
  0x14   : > { %p614_p12 = pneg %p842_p11  ;;  %p633_p6 = por %p632_p7, %p631_p5 }
  0x16   : > { %p626_p0 = pnand %p624_p13, %p614_p12 }
  0x18   : > { %p627_p3 = pneg %p626_p0 }
  0x1a   : > { %p634_p4 = pnand %p633_p6, %p627_p3 }
  0x1c   : > { %637 = shalt.err (!%p634_p4)
}
  0x1d   : > { %s753_s30 = smov 64   ;;  %s754_s4 = smov 4  }
  0x1e   : > { %538 = dma.hbm_to_vmem [thread:$0]  (!%p842_p11), %s960_s1, 1024, %s158_s26, [#allocation6], %s753_s30, %s753_s30, %s754_s4  }
  0x1f   : > { %p34_p6 = scmp.ge.s32.totalorder %s32_s28, 2  ;;  %s39_s7 = sadd.s32 1, %s738_s14 }
  0x20   : > { %p46_p4 = scmp.ne.s32.totalorder %s738_s14, %s734_s13  ;;  %p47_p9 = scmp.eq.s32.totalorder %s750_s17, 0 }
  0x21   : > { %s982_s28 = smov (%p34_p6, %s32_s28), 0  ;;  %p548_p0 = scmp.lt.s32.totalorder %s750_s17, 2 }
  0x22   : > { %p860_p12 = por %p47_p9, %p46_p4  ;;  %p866_p13 = por %p817_p2, %p46_p4 }
  0x23   : > { %s36_s10 = ssub.s32 %s746_s16, %s982_s28  ;;  %s177_s11 = sand.u32 1, %s738_s14  }
  0x24   : > { %p37_p11 = scmp.eq.s32.totalorder %s36_s10, 0  ;;  %s479_s18 = sshll.u32 %s177_s11, 2 }
  0x25   : > { %s480_s25 = sshll.u32 %s746_s16, 6  ;;  %s181_s30 = scalar_lea.vmem [#allocation2], %s479_s18 }
  0x26   : > { %s875_s19 = scalar_select %p37_p11, %s738_s14, %s39_s7  }
  0x27   : > { %s186_s29 = scalar_lea.hbm %s959_s0, %s480_s25  ;;  %s188_s4 = sshll.u32 %s181_s30, 4  ;;  %s189_s4 = int_to_ptr.vmem [resolvable:$true] %s188_s4 }
  0x28   : > { %p883_p2 = pnand %p548_p0, %p860_p12  ;;  %s178_s5 = scalar_lea.sflag [#allocation3], %s177_s11 }
  0x29   : > { %s651_s6 = scalar_lea.vmem %s189_s4, 64  ;;  %s755_s7 = smov [#allocation2]  }
  0x2a   : > { %p640_p3 = pneg %p883_p2  ;;  %p652_p5 = scmp.ne.s32.totalorder %s189_s4, %s651_s6 }
  0x2b   : > { %s656_s10 = sshll.u32 %s755_s7, 4  ;;  %s657_s10 = int_to_ptr.vmem [resolvable:$false] %s656_s10 }
  0x2c   : > { %p654_p7 = pnand %p652_p5, %p640_p3  ;;  %s658_s25 = scalar_lea.vmem %s657_s10, 128 }
  0x2d   : > { %p659_p4 = scmp.lt.s32.totalorder %s189_s4, %s657_s10  ;;  %p660_p9 = scmp.lt.s32.totalorder %s658_s25, %s651_s6 }
  0x2e   : > { %p655_p6 = pneg %p654_p7 }
  0x2f   : > { %p661_p11 = por %p660_p9, %p659_p4 }
  0x31   : > { %p662_p10 = pnand %p661_p11, %p655_p6 }
  0x33   : > { %665 = shalt.err (!%p662_p10)
}
  0x34   : > { %542 = dma.hbm_to_vmem [thread:$0]  (!%p883_p2), %s186_s29, 64, %s189_s4, %s178_s5  }
  0x35   : > { %197 = sbr.rel (%p833_p8) target bundleno = 307 (0x133), region = 32  ;;  %s894_s8 = sand.u32 (!%p833_p8), 1, %s734_s13  }
  0x36   : > { %s482_s11 = sshll.u32 (!%p833_p8), %s894_s8, 2  ;;  %s200_s18 = scalar_lea.sflag (!%p833_p8), [#allocation3], %s894_s8 }
  0x37   : > { %s898_s26 = scalar_lea.vmem (!%p833_p8), [#allocation2], %s482_s11  ;;  %p973_p12 = scmp.ne.s32.totalorder (!%p833_p8), %s966_s22, 0 }
  0x3a   : > { %717 = dma.done.wait (%p973_p12), %s200_s18, 64  }
  0x3b   : > { %719 = vsyncadd (%p973_p12), %s200_s18, 4294967232 }
  0x3c   : > { %721 = dma.done.wait (%p813_p1), [#allocation6], 1024  }
  0x3d   : > { %723 = vsyncadd (%p813_p1), [#allocation6], 4294966272  ;;  %v756_v0 = vmov 0.0   ;;  %vm757_vm0 = vmmov 0   ;;  %v604_v1 = vld [vmem:[#allocation5 + $0x38] sm:$0xff]   ;;  %v605_v2 = vld [vmem:[#allocation5 + $0x30] sm:$0xff]  }
  0x3e   : > { %507 = vmatprep.subr.bf16.mxu0 %v756_v0  ;;  %523 = vmatprep.mubr.msk.bf16.mxu0 %vm757_vm0, %v756_v0  ;;  %v606_v3 = vld [vmem:[#allocation5 + $0x28] sm:$0xff]   ;;  %v607_v4 = vld [vmem:[#allocation5 + $0x20] sm:$0xff]   ;;  %v608_v5 = vld [vmem:[#allocation5 + $0x18] sm:$0xff]   ;;  %s484_s20 = sshll.u32 %s894_s8, 3  ;;  %s495_s27 = sshll.u32 %s742_s15, 7 }
  0x3f   : > { %508 = vmatpush3.bf16.msra.mxu0 %v604_v1  ;;  %v609_v6 = vld [vmem:[#allocation5 + $0x10] sm:$0xff]   ;;  %v610_v7 = vld [vmem:[#allocation5 + $0x8] sm:$0xff]   ;;  %v611_v8 = vld [vmem:[#allocation5] sm:$0xff]   ;;  %s232_s29 = scalar_lea.vmem [#allocation7], %s484_s20  ;;  %s917_s5 = scalar_lea.hbm %s962_s3, %s495_s27 }
  0x40   : > { %509 = vmatprep.subr.bf16.mxu0 %v756_v0  ;;  %v237_v9 = vld [vmem:[%s898_s26] sm:$0xf]  ;;  %s370_s30 = sshll.u32 %s232_s29, 4  ;;  %s356_s6 = scalar_lea.sflag [#allocation4], %s894_s8  ;;  %s371_s30 = int_to_ptr.vmem [resolvable:$true] %s370_s30 }
  0x41   : > { %v493_v11 = vld [vmem:[%s961_s2] ss:$0 sm:$0xff]  ;;  %s666_s7 = scalar_lea.vmem %s371_s30, 128  ;;  %s758_s15 = smov [#allocation7]  }
  0x42   : > { %p667_p1 = scmp.ne.s32.totalorder %s371_s30, %s666_s7  ;;  %s670_s10 = sshll.u32 %s758_s15, 4  ;;  %s671_s10 = int_to_ptr.vmem [resolvable:$false] %s670_s10 }
  0x43   : > { %510 = vmatpush3.bf16.msra.mxu0 %v605_v2  ;;  %s672_s25 = scalar_lea.vmem %s671_s10, 256  ;;  %p673_p0 = scmp.lt.s32.totalorder %s371_s30, %s671_s10 }
  0x44   : > { %511 = vmatprep.subr.bf16.mxu0 %v756_v0  ;;  %p668_p8 = pnand %p667_p1, %p866_p13  ;;  %p674_p2 = scmp.lt.s32.totalorder %s672_s25, %s666_s7 }
  0x46   : > { %p669_p10 = pneg %p668_p8  ;;  %p675_p3 = por %p674_p2, %p673_p0 }
  0x47   : > { %512 = vmatpush3.bf16.msra.mxu0 %v606_v3 }
  0x48   : > { %513 = vmatprep.subr.bf16.mxu0 %v756_v0  ;;  %p676_p5 = pnand %p675_p3, %p669_p10 }
  0x4b   : > { %514 = vmatpush3.bf16.msra.mxu0 %v607_v4 }
  0x4c   : > { %515 = vmatprep.subr.bf16.mxu0 %v756_v0 }
  0x4f   : > { %516 = vmatpush3.bf16.msra.mxu0 %v608_v5 }
  0x50   : > { %517 = vmatprep.subr.bf16.mxu0 %v756_v0 }
  0x53   : > { %518 = vmatpush3.bf16.msra.mxu0 %v609_v6 }
  0x54   : > { %519 = vmatprep.subr.bf16.mxu0 %v756_v0 }
  0x57   : > { %520 = vmatpush3.bf16.msra.mxu0 %v610_v7 }
  0x58   : > { %521 = vmatprep.subr.bf16.mxu0 %v756_v0 }
  0x5b   : > { %522 = vmatpush3.bf16.msra.mxu0 %v611_v8 }
  0x5e   : > { %524 = vmatmul.mubr.bf16.vlgmr.msra.gmra.mxu0 %v237_v9 }
 0x11e   : > { %v336_v10 = vpop.f32.mrf.mxu0 }
 0x11f   : > { %v342_v12 = vmul.f32 0.25, %v336_v10 }
 0x120   : > { %v525_v13 = vpop.f32.mrf.mxu0 }
 0x121   : > { %v350_v14 = vadd.f32 %v493_v11, %v342_v12 }
 0x122   : > { %v339_v15 = vpop.f32.mrf.mxu0 }
 0x123   : > { %vm351_vm1 = vcmp.ge.f32.partialorder %v350_v14, 0.0  ;;  %v352_v16 = vmul.f32 0.2, %v350_v14 }
 0x124   : > { %v526_v17 = vpop.f32.mrf.mxu0 }
 0x125   : > { %v353_v18 = vsel %vm351_vm1, %v350_v14, %v352_v16 }
 0x126   : > { %354 = vst [vmem:[%s232_s29] sm:$0xff] %v353_v18 }
 0x127   : > { %679 = shalt.err (!%p676_p5)
}
 0x128   : > { %s680_s11 = scalar_lea.hbm %s917_s5, 128  ;;  %s684_s26 = scalar_lea.hbm %s962_s3, 256 }
 0x129   : > { %p681_p7 = scmp.ne.s32.totalorder %s917_s5, %s680_s11  ;;  %p685_p9 = scmp.lt.s32.totalorder %s917_s5, %s962_s3 }
 0x12a   : > { %p686_p11 = scmp.lt.s32.totalorder %s684_s26, %s680_s11 }
 0x12b   : > { %p682_p6 = pnand %p681_p7, %p866_p13 }
 0x12c   : > { %p687_p12 = por %p686_p11, %p685_p9 }
 0x12d   : > { %p683_p4 = pneg %p682_p6 }
 0x12f   : > { %p688_p1 = pnand %p687_p12, %p683_p4 }
 0x131   : > { %691 = shalt.err (!%p688_p1)
}
 0x132   : > { %533 = dma.vmem_to_hbm [thread:$0]  (%p866_p13), %s371_s30, 128, %s917_s5, %s356_s6  }
 0x133 PF: > { %s382_s24 = sand.u32 1, %s730_s12   ;;  %p974_p8 = scmp.ne.s32.totalorder %s967_s23, 0 }
 0x134   : > { %p975_p10 = scmp.ge.s32.totalorder %s750_s17, 2  ;;  %s383_s27 = scalar_lea.sflag [#allocation4], %s382_s24 }
 0x136   : > { %p544_p0 = pnand %p975_p10, %p974_p8 }
 0x138   : > { %p545_p2 = pneg %p544_p0 }
 0x13a   : > { %725 = dma.done.wait (%p545_p2), %s383_s27, 128  }
 0x13b   : > { %727 = vsyncadd (%p545_p2), %s383_s27, 4294967168  ;;  %s20_s17 = sadd.s32 1, %s750_s17   ;;  %s976_s12 = smov %s734_s13 }
 0x13c   : > { %p17_p3 = scmp.ge.s32.totalorder %s20_s17, 4   ;;  %s977_s13 = smov %s738_s14 }
 0x13d   : > { %s978_s14 = smov %s875_s19  ;;  %s979_s15 = smov %s746_s16 }
 0x13e   : > { %s980_s16 = smov %s982_s28  ;;  %19 = sbr.rel (!%p17_p3) target bundleno = 7 (0x7), region = 85 }
 0x143   :  { %388 = vsyncpa [#allocation3], 1 }
 0x144   :  { %390 = vsyncpa [#allocation3 + $0x1], 1 }
 0x145   :  { %391 = vsyncpa [#allocation6], 1 }
 0x146   :  { %392 = vsyncpa [#allocation4], 1 }
 0x147   :  { %394 = vsyncpa [#allocation4 + $0x1], 1 }

</bundles_post_ra>
